<compile_context>
chip_gen: v5e
topology: v5e:2x2
jax: 0.10.0
libtpu: 0.0.40
codegen_flags: <defaults>
</compile_context>

<pallas_src>
import functools
import math

import jax
import jax.numpy as jnp
from jax.experimental import pallas as pl
from jax.experimental.pallas import tpu as pltpu

LANE = 128  # TPU lane width


def _round_up(x, m):
    return ((x + m - 1) // m) * m


def _mlp_kernel(*refs):
    """Fused MLP over one batch tile.

    refs = (x_ref, w0_ref, b0_ref, w1_ref, b1_ref, ..., wL_ref, bL_ref, out_ref)
    Activations/weights are bf16 (MXU fast path), accumulation is f32, biases are f32.
    ReLU after every layer except the last (logits output).
    """
    x_ref = refs[0]
    out_ref = refs[-1]
    param_refs = refs[1:-1]
    n_layers = len(param_refs) // 2

    h = x_ref[...]                                    # bf16 (TB, P_in0)
    for i in range(n_layers):
        w = param_refs[2 * i][...]                    # bf16 (P_in, P_out)
        b = param_refs[2 * i + 1][...]                # f32  (1, P_out)
        acc = jnp.dot(h, w, preferred_element_type=jnp.float32) + b
        if i < n_layers - 1:
            h = jnp.maximum(acc, 0.0).astype(jnp.bfloat16)   # ReLU, back to bf16 for MXU
        else:
            h = acc                                          # logits stay f32
    out_ref[...] = h.astype(out_ref.dtype)


def init_policy_params(key, state_size, action_size, hidden_sizes, dtype=jnp.float32):
    """PyTorch nn.Linear-style init U(-1/sqrt(fan_in), 1/sqrt(fan_in)).

    Returns [(w0, b0), (w1, b1), ...] with w stored as (in, out) (i.e. PyTorch weight.T)
    and b as (out,), all in f32.
    """
    dims = [state_size] + list(hidden_sizes) + [action_size]
    params = []
    for i in range(len(dims) - 1):
        fan_in, fan_out = dims[i], dims[i + 1]
        key, kw, kb = jax.random.split(key, 3)
        bound = 1.0 / math.sqrt(fan_in)
        w = jax.random.uniform(kw, (fan_in, fan_out), dtype, minval=-bound, maxval=bound)
        b = jax.random.uniform(kb, (fan_out,), dtype, minval=-bound, maxval=bound)
        params.append((w, b))
    return params


def pad_params_for_kernel(params):
    """Zero-pad every layer dim to a multiple of 128 lanes and cast weights to bf16.
    Biases stay f32 as (1, P_out).  Zero padding keeps the padded computation exactly
    equal to the unpadded one."""
    padded = []
    for w, b in params:
        fi, fo = w.shape
        pi, po = _round_up(fi, LANE), _round_up(fo, LANE)
        w_p = jnp.zeros((pi, po), jnp.bfloat16).at[:fi, :fo].set(w.astype(jnp.bfloat16))
        b_p = jnp.zeros((1, po), jnp.float32).at[0, :fo].set(b.astype(jnp.float32))
        padded.extend([w_p, b_p])
    return padded


@functools.partial(jax.jit, static_argnames=("action_size", "batch_tile"))
def policy_forward(state, padded_params, *, action_size, batch_tile=512):
    """state: (batch, state_size) f32 -> logits: (batch, action_size) f32."""
    batch, state_size = state.shape
    n_layers = len(padded_params) // 2
    p_in0 = padded_params[0].shape[0]
    p_out_last = padded_params[-1].shape[1]

    # Batch tile: multiple of 16 sublanes (bf16 activations pack 16 rows / vreg).
    tb = min(batch_tile, _round_up(batch, 16))
    padded_batch = _round_up(batch, tb)
    grid = (padded_batch // tb,)

    # Lane-dense, zero-padded bf16 input slab.
    x = jnp.pad(state.astype(jnp.bfloat16),
                ((0, padded_batch - batch), (0, p_in0 - state_size)))

    # Activations/output walk the batch grid; weights/biases are VMEM-resident.
    in_specs = [pl.BlockSpec((tb, p_in0), lambda i: (i, 0))]
    for li in range(n_layers):
        w = padded_params[2 * li]
        b = padded_params[2 * li + 1]
        in_specs.append(pl.BlockSpec(w.shape, lambda i: (0, 0)))
        in_specs.append(pl.BlockSpec(b.shape, lambda i: (0, 0)))
    out_spec = pl.BlockSpec((tb, p_out_last), lambda i: (i, 0))

    # Rough double-buffered VMEM footprint -> explicit limit (<= 64 MiB so v7x-safe).
    def _bytes(shape, dt):
        return math.prod(shape) * jnp.dtype(dt).itemsize

    est = 2 * _bytes((tb, p_in0), jnp.bfloat16) + 2 * _bytes((tb, p_out_last), jnp.float32)
    flops = 0
    bytes_accessed = x.size * x.dtype.itemsize + padded_batch * p_out_last * 4
    for li in range(n_layers):
        w = padded_params[2 * li]
        b = padded_params[2 * li + 1]
        est += 2 * w.size * w.dtype.itemsize + 2 * b.size * b.dtype.itemsize
        est += _bytes((tb, w.shape[1]), jnp.float32)  # live f32 activation
        flops += 2 * padded_batch * w.shape[0] * w.shape[1]
        bytes_accessed += w.size * w.dtype.itemsize + b.size * b.dtype.itemsize
    vmem_limit = int(min(64 * 2**20, max(16 * 2**20, 4 * est)))

    out = pl.pallas_call(
        _mlp_kernel,
        out_shape=jax.ShapeDtypeStruct((padded_batch, p_out_last), jnp.float32),
        grid=grid,
        in_specs=in_specs,
        out_specs=out_spec,
        compiler_params=pltpu.CompilerParams(
            dimension_semantics=("parallel",),
            vmem_limit_bytes=vmem_limit,
        ),
        cost_estimate=pl.CostEstimate(
            flops=flops, transcendentals=0, bytes_accessed=bytes_accessed),
    )(x, *padded_params)

    return out[:batch, :action_size]


def reference_forward_bf16(state, params):
    """Pure-JAX reference with identical bf16-operand / f32-accumulate math."""
    h = state.astype(jnp.bfloat16)
    n = len(params)
    for i, (w, b) in enumerate(params):
        acc = jnp.dot(h, w.astype(jnp.bfloat16),
                      preferred_element_type=jnp.float32) + b.astype(jnp.float32)
        if i < n - 1:
            h = jnp.maximum(acc, 0.0).astype(jnp.bfloat16)
        else:
            h = acc
    return h


def reference_forward_f32(state, params):
    """Full-f32 reference matching the PyTorch module's math."""
    h = state.astype(jnp.float32)
    n = len(params)
    for i, (w, b) in enumerate(params):
        h = h @ w.astype(jnp.float32) + b.astype(jnp.float32)
        if i < n - 1:
            h = jnp.maximum(h, 0.0)
    return h


if __name__ == "__main__":
    # Shapes consistent with the module: state_size=32, hidden_sizes=[64, 64], action_size=8.
    state_size = 32
    action_size = 8
    hidden_sizes = [64, 64]

    key = jax.random.PRNGKey(0)
    key, k_state = jax.random.split(key)

    params = init_policy_params(key, state_size, action_size, hidden_sizes)
    padded_params = pad_params_for_kernel(params)

    # batch=4 exercises the small-batch padding path; batch=256 with TB=128 exercises a
    # 2-step parallel batch grid (both TensorCores on v7x).
    for batch, tile in ((4, 512), (256, 128)):
        k_b = jax.random.fold_in(k_state, batch)
        state = jax.random.normal(k_b, (batch, state_size), dtype=jnp.float32)

        logits = policy_forward(state, padded_params, action_size=action_size,
                                batch_tile=tile)
        logits = jax.block_until_ready(logits)
        assert logits.shape == (batch, action_size), logits.shape

        # Tight check vs a reference doing the same bf16-operand / f32-accum math.
        ref_bf16 = reference_forward_bf16(state, params)
        assert jnp.allclose(logits, ref_bf16, atol=2e-3, rtol=2e-3), \
            "mismatch vs bf16 reference"

        # Loose sanity check vs the full-f32 PyTorch-equivalent math
        # (bf16 operand rounding only).
        ref_f32 = reference_forward_f32(state, params)
        assert jnp.allclose(logits, ref_f32, atol=0.15, rtol=0.05), \
            "mismatch vs f32 reference"

    print("KERNEL_OK")
</pallas_src>

<mosaic_0001>
module attributes {stable_mosaic.version = 11 : i64} {
  func.func @_mlp_kernel(%arg0: i32, %arg1: memref<16x128xbf16, #tpu.memory_space<vmem>>, %arg2: memref<128x128xbf16, #tpu.memory_space<vmem>>, %arg3: memref<1x128xf32, #tpu.memory_space<vmem>>, %arg4: memref<128x128xbf16, #tpu.memory_space<vmem>>, %arg5: memref<1x128xf32, #tpu.memory_space<vmem>>, %arg6: memref<128x128xbf16, #tpu.memory_space<vmem>>, %arg7: memref<1x128xf32, #tpu.memory_space<vmem>>, %arg8: memref<16x128xf32, #tpu.memory_space<vmem>>) attributes {dimension_semantics = [#tpu.dimension_semantics<parallel>], iteration_bounds = array<i64: 1>, scalar_prefetch = 0 : i64, scratch_operands = 0 : i64, tpu.core_type = #tpu.core_type<tc>, window_params = [{transform_indices = @transform_0, window_bounds = array<i64: 16, 128>}, {pipeline_mode = #tpu.pipeline_mode<synchronous>, transform_indices = @transform_1, window_bounds = array<i64: 128, 128>}, {pipeline_mode = #tpu.pipeline_mode<synchronous>, transform_indices = @transform_2, window_bounds = array<i64: 1, 128>}, {pipeline_mode = #tpu.pipeline_mode<synchronous>, transform_indices = @transform_3, window_bounds = array<i64: 128, 128>}, {pipeline_mode = #tpu.pipeline_mode<synchronous>, transform_indices = @transform_4, window_bounds = array<i64: 1, 128>}, {pipeline_mode = #tpu.pipeline_mode<synchronous>, transform_indices = @transform_5, window_bounds = array<i64: 128, 128>}, {pipeline_mode = #tpu.pipeline_mode<synchronous>, transform_indices = @transform_6, window_bounds = array<i64: 1, 128>}, {transform_indices = @transform_7, window_bounds = array<i64: 16, 128>}]} {
    %c0 = arith.constant 0 : index
    %c0_0 = arith.constant 0 : index
    %0 = vector.load %arg1[%c0, %c0_0] : memref<16x128xbf16, #tpu.memory_space<vmem>>, vector<16x128xbf16>
    %c0_1 = arith.constant 0 : index
    %c0_2 = arith.constant 0 : index
    %1 = vector.load %arg2[%c0_1, %c0_2] : memref<128x128xbf16, #tpu.memory_space<vmem>>, vector<128x128xbf16>
    %c0_3 = arith.constant 0 : index
    %c0_4 = arith.constant 0 : index
    %2 = vector.load %arg3[%c0_3, %c0_4] : memref<1x128xf32, #tpu.memory_space<vmem>>, vector<1x128xf32>
    %cst = arith.constant dense<0.000000e+00> : vector<16x128xf32>
    %3 = tpu.matmul %0, %1, %cst {dimension_numbers = #tpu.dot_dimension_numbers<[1], [0], [0], [1], [0, 0, 1, 1], [], []>} : vector<16x128xbf16>, vector<128x128xbf16>, vector<16x128xf32> -> vector<16x128xf32>
    %4 = vector.broadcast %2 : vector<1x128xf32> to vector<16x128xf32>
    %5 = arith.addf %3, %4 : vector<16x128xf32>
    %cst_5 = arith.constant 0.000000e+00 : f32
    %6 = vector.broadcast %cst_5 : f32 to vector<16x128xf32>
    %7 = arith.maximumf %5, %6 : vector<16x128xf32>
    %8 = arith.truncf %7 : vector<16x128xf32> to vector<16x128xbf16>
    %c0_6 = arith.constant 0 : index
    %c0_7 = arith.constant 0 : index
    %9 = vector.load %arg4[%c0_6, %c0_7] : memref<128x128xbf16, #tpu.memory_space<vmem>>, vector<128x128xbf16>
    %c0_8 = arith.constant 0 : index
    %c0_9 = arith.constant 0 : index
    %10 = vector.load %arg5[%c0_8, %c0_9] : memref<1x128xf32, #tpu.memory_space<vmem>>, vector<1x128xf32>
    %cst_10 = arith.constant dense<0.000000e+00> : vector<16x128xf32>
    %11 = tpu.matmul %8, %9, %cst_10 {dimension_numbers = #tpu.dot_dimension_numbers<[1], [0], [0], [1], [0, 0, 1, 1], [], []>} : vector<16x128xbf16>, vector<128x128xbf16>, vector<16x128xf32> -> vector<16x128xf32>
    %12 = vector.broadcast %10 : vector<1x128xf32> to vector<16x128xf32>
    %13 = arith.addf %11, %12 : vector<16x128xf32>
    %cst_11 = arith.constant 0.000000e+00 : f32
    %14 = vector.broadcast %cst_11 : f32 to vector<16x128xf32>
    %15 = arith.maximumf %13, %14 : vector<16x128xf32>
    %16 = arith.truncf %15 : vector<16x128xf32> to vector<16x128xbf16>
    %c0_12 = arith.constant 0 : index
    %c0_13 = arith.constant 0 : index
    %17 = vector.load %arg6[%c0_12, %c0_13] : memref<128x128xbf16, #tpu.memory_space<vmem>>, vector<128x128xbf16>
    %c0_14 = arith.constant 0 : index
    %c0_15 = arith.constant 0 : index
    %18 = vector.load %arg7[%c0_14, %c0_15] : memref<1x128xf32, #tpu.memory_space<vmem>>, vector<1x128xf32>
    %cst_16 = arith.constant dense<0.000000e+00> : vector<16x128xf32>
    %19 = tpu.matmul %16, %17, %cst_16 {dimension_numbers = #tpu.dot_dimension_numbers<[1], [0], [0], [1], [0, 0, 1, 1], [], []>} : vector<16x128xbf16>, vector<128x128xbf16>, vector<16x128xf32> -> vector<16x128xf32>
    %20 = vector.broadcast %18 : vector<1x128xf32> to vector<16x128xf32>
    %21 = arith.addf %19, %20 : vector<16x128xf32>
    %c0_17 = arith.constant 0 : index
    %c0_18 = arith.constant 0 : index
    %22 = vector.load %arg8[%c0_17, %c0_18] : memref<16x128xf32, #tpu.memory_space<vmem>>, vector<16x128xf32>
    tpu.vector_store %arg8[%c0_17, %c0_18], %21 {strides = array<i32>} : memref<16x128xf32, #tpu.memory_space<vmem>>, vector<16x128xf32>,
    return
  }
  func.func @transform_0(%arg0: i32) -> (i32, i32) {
    %c0_i32 = arith.constant 0 : i32
    %c0_i32_0 = arith.constant 0 : i32
    return %arg0, %c0_i32 : i32, i32
  }
  func.func @transform_1(%arg0: i32) -> (i32, i32) {
    %c0_i32 = arith.constant 0 : i32
    %c0_i32_0 = arith.constant 0 : i32
    %c0_i32_1 = arith.constant 0 : i32
    return %c0_i32, %c0_i32_0 : i32, i32
  }
  func.func @transform_2(%arg0: i32) -> (i32, i32) {
    %c0_i32 = arith.constant 0 : i32
    %c0_i32_0 = arith.constant 0 : i32
    %c0_i32_1 = arith.constant 0 : i32
    return %c0_i32, %c0_i32_0 : i32, i32
  }
  func.func @transform_3(%arg0: i32) -> (i32, i32) {
    %c0_i32 = arith.constant 0 : i32
    %c0_i32_0 = arith.constant 0 : i32
    %c0_i32_1 = arith.constant 0 : i32
    return %c0_i32, %c0_i32_0 : i32, i32
  }
  func.func @transform_4(%arg0: i32) -> (i32, i32) {
    %c0_i32 = arith.constant 0 : i32
    %c0_i32_0 = arith.constant 0 : i32
    %c0_i32_1 = arith.constant 0 : i32
    return %c0_i32, %c0_i32_0 : i32, i32
  }
  func.func @transform_5(%arg0: i32) -> (i32, i32) {
    %c0_i32 = arith.constant 0 : i32
    %c0_i32_0 = arith.constant 0 : i32
    %c0_i32_1 = arith.constant 0 : i32
    return %c0_i32, %c0_i32_0 : i32, i32
  }
  func.func @transform_6(%arg0: i32) -> (i32, i32) {
    %c0_i32 = arith.constant 0 : i32
    %c0_i32_0 = arith.constant 0 : i32
    %c0_i32_1 = arith.constant 0 : i32
    return %c0_i32, %c0_i32_0 : i32, i32
  }
  func.func @transform_7(%arg0: i32) -> (i32, i32) {
    %c0_i32 = arith.constant 0 : i32
    %c0_i32_0 = arith.constant 0 : i32
    return %arg0, %c0_i32 : i32, i32
  }
}

</mosaic_0001>

<bundles_post_ra>
// kernel: policy_forward.1
= control target key start
LH: loop header
LB: loop body
LE: loop exit
PB: predicated region body
PF: predicated region fallthrough
CT: control target
= control target key end

     0   :  { %12 = vsyncpa [#allocation3], 0  ;;  %s622_s0 = inlined_call_operand.vmem [shape: bf16[16,128], index: 0, kind: input, shape index: {}]   ;;  %s623_s1 = inlined_call_operand.hbm [shape: bf16[128,128], index: 1, kind: input, shape index: {}]   ;;  %s624_s2 = inlined_call_operand.vmem [shape: f32[1,128], index: 2, kind: input, shape index: {}]   ;;  %s625_s3 = inlined_call_operand.hbm [shape: bf16[128,128], index: 3, kind: input, shape index: {}]   ;;  %s626_s4 = inlined_call_operand.vmem [shape: f32[1,128], index: 4, kind: input, shape index: {}]   ;;  %s627_s5 = inlined_call_operand.hbm [shape: bf16[128,128], index: 5, kind: input, shape index: {}]   ;;  %s628_s6 = inlined_call_operand.vmem [shape: f32[1,128], index: 6, kind: input, shape index: {}]   ;;  %s629_s7 = inlined_call_operand.vmem [shape: f32[16,128], index: 7, kind: output, shape index: {}]  }
   0x1   :  { %13 = vsyncpa [#allocation5], 0  ;;  %s35_s26 = sshll.u32 %s625_s3, 4  ;;  %s550_s27 = smov [#allocation4]   ;;  %s36_s26 = int_to_ptr.hbm [resolvable:$true] %s35_s26 }
   0x2   :  { %s37_s28 = sshll.u32 %s550_s27, 4  ;;  %s20_s8 = sshll.u32 %s623_s1, 4  ;;  %s38_s28 = int_to_ptr.vmem [resolvable:$true] %s37_s28  ;;  %s21_s8 = int_to_ptr.hbm [resolvable:$true] %s20_s8 }
   0x3   :  { %s551_s9 = smov 64   ;;  %s552_s10 = smov 4  }
   0x4   :  { %43 = dma.hbm_to_vmem [thread:$0]  %s36_s26, 1024, %s38_s28, [#allocation5], %s551_s9, %s551_s9, %s552_s10  }
   0x5   :  { %s553_s11 = smov [#allocation2]   ;;  %s50_s15 = sshll.u32 %s627_s5, 4  ;;  %s51_s15 = int_to_ptr.hbm [resolvable:$true] %s50_s15 }
   0x6   :  { %s22_s12 = sshll.u32 %s553_s11, 4  ;;  %s554_s3 = smov [#allocation6]   ;;  %s23_s12 = int_to_ptr.vmem [resolvable:$true] %s22_s12 }
   0x7   :  { %28 = dma.hbm_to_vmem [thread:$0]  %s21_s8, 1024, %s23_s12, [#allocation3], %s551_s9, %s551_s9, %s552_s10  }
   0x8   :  { %s52_s16 = sshll.u32 %s554_s3, 4  ;;  %s53_s16 = int_to_ptr.vmem [resolvable:$true] %s52_s16 }
   0x9   :  { %58 = dma.hbm_to_vmem [thread:$0]  %s51_s15, 1024, %s53_s16, [#allocation5], %s551_s9, %s551_s9, %s552_s10  }
   0xa   :  { %546 = dma.done.wait [#allocation3], 1024  }
   0xb   :  { %547 = vsyncadd [#allocation3], 4294966272 }
   0xc   :  { %548 = dma.done.wait [#allocation5], 2048  }
   0xd   :  { %549 = vsyncadd [#allocation5], 4294965248  ;;  %v449_v0 = vld [vmem:[#allocation2 + $0x38] sm:$0xff]  ;;  %v448_v1 = vld [vmem:[#allocation2 + $0x30] sm:$0xff] }
   0xe   :  { %149 = vmatpush.bf16.msra.mxu0 %v449_v0  ;;  %v457_v2 = vld [vmem:[#allocation4 + $0x38] sm:$0xff]  ;;  %v456_v3 = vld [vmem:[#allocation4 + $0x30] sm:$0xff]  ;;  %v447_v4 = vld [vmem:[#allocation2 + $0x28] sm:$0xff] }
   0xf   :  { %234 = vmatpush.bf16.msra.mxu1 %v457_v2  ;;  %v455_v5 = vld [vmem:[#allocation4 + $0x28] sm:$0xff]  ;;  %v446_v6 = vld [vmem:[#allocation2 + $0x20] sm:$0xff]  ;;  %v445_v8 = vld [vmem:[#allocation2 + $0x18] sm:$0xff] }
  0x10   :  { %v454_v7 = vld [vmem:[#allocation4 + $0x20] sm:$0xff]  ;;  %v444_v9 = vld [vmem:[#allocation2 + $0x10] sm:$0xff]  ;;  %v443_v10 = vld [vmem:[#allocation2 + $0x8] sm:$0xff] }
  0x11   :  { %v442_v11 = vld [vmem:[#allocation2] sm:$0xff]  ;;  %v453_v13 = vld [vmem:[#allocation4 + $0x18] sm:$0xff]  ;;  %v452_v14 = vld [vmem:[#allocation4 + $0x10] sm:$0xff] }
  0x12   :  { %150 = vmatpush.bf16.msra.mxu0 %v448_v1  ;;  %v441_v12 = vld [vmem:[%s622_s0] sm:$0xff]  ;;  %v451_v15 = vld [vmem:[#allocation4 + $0x8] sm:$0xff]  ;;  %v465_v17 = vld [vmem:[#allocation6 + $0x38] sm:$0xff] }
  0x13   :  { %235 = vmatpush.bf16.msra.mxu1 %v456_v3  ;;  %v450_v16 = vld [vmem:[#allocation4] sm:$0xff]  ;;  %319 = vmatpush.bf16.msra.mxu2 %v465_v17  ;;  %v464_v18 = vld [vmem:[#allocation6 + $0x30] sm:$0xff]  ;;  %v463_v19 = vld [vmem:[#allocation6 + $0x28] sm:$0xff] }
  0x14   :  { %v462_v20 = vld [vmem:[#allocation6 + $0x20] sm:$0xff]  ;;  %v461_v29 = vld [vmem:[#allocation6 + $0x18] sm:$0xff]  ;;  %v460_v30 = vld [vmem:[#allocation6 + $0x10] sm:$0xff] }
  0x15   :  { %v471_v22 = vld [vmem:[%s624_s2] ss:$0 sm:$0xff]  ;;  %v459_v31 = vld [vmem:[#allocation6 + $0x8] sm:$0xff] }
  0x16   :  { %151 = vmatpush.bf16.msra.mxu0 %v447_v4  ;;  %v458_v32 = vld [vmem:[#allocation6] sm:$0xff] }
  0x17   :  { %236 = vmatpush.bf16.msra.mxu1 %v455_v5  ;;  %320 = vmatpush.bf16.msra.mxu2 %v464_v18  ;;  %v472_v34 = vld [vmem:[%s626_s4] ss:$0 sm:$0xff] }
  0x18   :  { %v473_v41 = vld [vmem:[%s628_s6] ss:$0 sm:$0xff] }
  0x1a   :  { %152 = vmatpush.bf16.msra.mxu0 %v446_v6 }
  0x1b   :  { %237 = vmatpush.bf16.msra.mxu1 %v454_v7  ;;  %321 = vmatpush.bf16.msra.mxu2 %v463_v19 }
  0x1e   :  { %153 = vmatpush.bf16.msra.mxu0 %v445_v8 }
  0x1f   :  { %238 = vmatpush.bf16.msra.mxu1 %v453_v13  ;;  %322 = vmatpush.bf16.msra.mxu2 %v462_v20 }
  0x22   :  { %154 = vmatpush.bf16.msra.mxu0 %v444_v9 }
  0x23   :  { %239 = vmatpush.bf16.msra.mxu1 %v452_v14  ;;  %323 = vmatpush.bf16.msra.mxu2 %v461_v29 }
  0x26   :  { %155 = vmatpush.bf16.msra.mxu0 %v443_v10 }
  0x27   :  { %240 = vmatpush.bf16.msra.mxu1 %v451_v15  ;;  %324 = vmatpush.bf16.msra.mxu2 %v460_v30 }
  0x2a   :  { %156 = vmatpush.bf16.msra.mxu0 %v442_v11 }
  0x2b   :  { %241 = vmatpush.bf16.msra.mxu1 %v450_v16  ;;  %325 = vmatpush.bf16.msra.mxu2 %v459_v31 }
  0x2d   :  { %157 = vmatmul.bf16.vlgmr.msra.gmra.mxu0 %v441_v12 }
  0x2f   :  { %326 = vmatpush.bf16.msra.mxu2 %v458_v32 }
  0xaa   :  { %v158_v21 = vpop.f32.mrf.mxu0 }
  0xab   :  { %v159_v23 = vadd.f32 %v471_v22, %v158_v21 }
  0xad   :  { %v163_v26 = vmax.f32 %v159_v23, 0.0 }
  0xb2   :  { %v160_v24 = vpop.f32.mrf.mxu0 }
  0xb3   :  { %v161_v25 = vadd.f32 %v471_v22, %v160_v24 }
  0xb5   :  { %v164_v27 = vmax.f32 %v161_v25, 0.0 }
  0xb7   :  { %v165_v28 = vpack.c.bf16 %v164_v27, %v163_v26 }
  0xb9   :  { %242 = vmatmul.bf16.vlgmr.msra.gmra.mxu1 %v165_v28 }
 0x136   :  { %v243_v33 = vpop.f32.mrf.mxu1 }
 0x137   :  { %v244_v35 = vadd.f32 %v472_v34, %v243_v33 }
 0x139   :  { %v248_v38 = vmax.f32 %v244_v35, 0.0 }
 0x13e   :  { %v245_v36 = vpop.f32.mrf.mxu1 }
 0x13f   :  { %v246_v37 = vadd.f32 %v472_v34, %v245_v36 }
 0x141   :  { %v249_v39 = vmax.f32 %v246_v37, 0.0 }
 0x143   :  { %v250_v40 = vpack.c.bf16 %v249_v39, %v248_v38 }
 0x145   :  { %327 = vmatmul.bf16.vlgmr.msra.gmra.mxu2 %v250_v40 }
 0x1c8   :  { %v328_v42 = vpop.f32.mrf.mxu2 }
 0x1c9   :  { %v329_v43 = vadd.f32 %v473_v41, %v328_v42 }
 0x1cb   :  { %333 = vst [vmem:[%s629_s7] sm:$0xff] %v329_v43 }
 0x1d0   :  { %v330_v44 = vpop.f32.mrf.mxu2 }
 0x1d1   :  { %v331_v45 = vadd.f32 %v473_v41, %v330_v44 }
 0x1d3   :  { %334 = vst [vmem:[%s629_s7 + $0x8] sm:$0xff] %v331_v45 }
 0x1d4   :  { %339 = vsyncpa [#allocation3], 1 }
 0x1d5   :  { %340 = vsyncpa [#allocation5], 1 }

</bundles_post_ra>
